<compile_context>
chip_gen: v7x
topology: tpu7x:2x2x1
jax: 0.10.0
libtpu: 0.0.40
codegen_flags: <defaults>
</compile_context>

<pallas_src>
import jax
import jax.numpy as jnp
from jax.experimental import pallas as pl
from jax.experimental.pallas import tpu as pltpu


# --------------------------------------------------------------------------
# helpers
# --------------------------------------------------------------------------
def _round_up(x, m):
    return ((x + m - 1) // m) * m


def _choose_tm(M, H, R, n_full_streams, itemsize, cap=512,
               budget_bytes=32 << 20):
    """Largest row-tile whose double-buffered VMEM footprint fits the budget."""
    per_row = (n_full_streams * H + R) * itemsize       # bytes per row, all streams
    tm = budget_bytes // (2 * per_row)                  # x2 for double buffering
    tm = max(8, min(cap, (tm // 8) * 8))                # multiple of 8, capped
    tm = min(tm, _round_up(M, 8))                       # no bigger than the problem
    return tm


def _pad_rows(x2d, Mp):
    M = x2d.shape[0]
    if Mp == M:
        return x2d
    return jnp.pad(x2d, ((0, Mp - M), (0, 0)))


def _unpad_rows(x2d, M):
    return x2d if x2d.shape[0] == M else x2d[:M]


_VMEM_LIMIT = 64 << 20  # fits v7x's 64 MiB physical VMEM; plenty on v5e/v6e


# --------------------------------------------------------------------------
# Kernel 1: Hadamard product + LoRA-2 residual (calibration / no-prune path)
#   result  = x1 * x2
#   x2_main = x2 - a2 @ b2
# --------------------------------------------------------------------------
def _hadamard_lora_kernel(x1_ref, x2_ref, a2_ref, b2_ref,
                          result_ref, x2_main_ref):
    x1 = x1_ref[...]
    x2 = x2_ref[...]
    result_ref[...] = x1 * x2
    res2 = jnp.dot(a2_ref[...], b2_ref[...],
                   preferred_element_type=jnp.float32)
    x2_main_ref[...] = (x2.astype(jnp.float32) - res2).astype(x2_main_ref.dtype)


def _hadamard_lora(x1, x2, a2, b2, tm_cap=512):
    B, S, H = x1.shape
    R = a2.shape[-1]
    M = B * S
    dt = x1.dtype
    itemsize = jnp.dtype(dt).itemsize

    # streamed (tm, H) buffers: x1, x2, result, x2_main  (+ small a2)
    tm = _choose_tm(M, H, R, 4, itemsize, cap=tm_cap)
    Mp = _round_up(M, tm)

    x1_2d = _pad_rows(x1.reshape(M, H), Mp)
    x2_2d = _pad_rows(x2.reshape(M, H), Mp)
    a2_2d = _pad_rows(a2.reshape(M, R), Mp)

    act_spec = pl.BlockSpec((tm, H), lambda i: (i, 0))
    lora_spec = pl.BlockSpec((tm, R), lambda i: (i, 0))
    w_spec = pl.BlockSpec((R, H), lambda i: (0, 0))

    result, x2_main = pl.pallas_call(
        _hadamard_lora_kernel,
        out_shape=(jax.ShapeDtypeStruct((Mp, H), dt),) * 2,
        grid_spec=pltpu.PrefetchScalarGridSpec(
            num_scalar_prefetch=0,
            grid=(Mp // tm,),
            in_specs=[act_spec, act_spec, lora_spec, w_spec],
            out_specs=[act_spec, act_spec],
        ),
        compiler_params=pltpu.CompilerParams(
            dimension_semantics=("parallel",),
            vmem_limit_bytes=_VMEM_LIMIT),
    )(x1_2d, x2_2d, a2_2d, b2)

    return (_unpad_rows(result, M).reshape(B, S, H),
            _unpad_rows(x2_main, M).reshape(B, S, H))


# --------------------------------------------------------------------------
# Kernel 2: fully fused steady-state path (iteration >= 10).
# Thresholds arrive via scalar prefetch (SMEM); pruning happens in-register,
# so x1/x2 are read once and result/x1_main/x2_main written once.
# --------------------------------------------------------------------------
def _hadamard_lora_prune_kernel(kth_ref, x1_ref, x2_ref, a2_ref, b2_ref,
                                result_ref, x1_main_ref, x2_main_ref):
    x1 = x1_ref[...]
    x2 = x2_ref[...]
    result_ref[...] = x1 * x2

    res2 = jnp.dot(a2_ref[...], b2_ref[...],
                   preferred_element_type=jnp.float32)
    x2m = x2.astype(jnp.float32) - res2
    x1f = x1.astype(jnp.float32)

    kth1 = kth_ref[0]
    kth2 = kth_ref[1]
    x1_main_ref[...] = jnp.where(jnp.abs(x1f) > kth1, x1f,
                                 0.0).astype(x1_main_ref.dtype)
    x2_main_ref[...] = jnp.where(jnp.abs(x2m) > kth2, x2m,
                                 0.0).astype(x2_main_ref.dtype)


def _hadamard_lora_prune(x1, x2, a2, b2, kth, tm_cap=512):
    B, S, H = x1.shape
    R = a2.shape[-1]
    M = B * S
    dt = x1.dtype
    itemsize = jnp.dtype(dt).itemsize

    # streamed (tm, H) buffers: x1, x2, result, x1_main, x2_main
    tm = _choose_tm(M, H, R, 5, itemsize, cap=tm_cap)
    Mp = _round_up(M, tm)

    x1_2d = _pad_rows(x1.reshape(M, H), Mp)
    x2_2d = _pad_rows(x2.reshape(M, H), Mp)
    a2_2d = _pad_rows(a2.reshape(M, R), Mp)

    act_spec = pl.BlockSpec((tm, H), lambda i, kth_ref: (i, 0))
    lora_spec = pl.BlockSpec((tm, R), lambda i, kth_ref: (i, 0))
    w_spec = pl.BlockSpec((R, H), lambda i, kth_ref: (0, 0))

    result, x1_main, x2_main = pl.pallas_call(
        _hadamard_lora_prune_kernel,
        out_shape=(jax.ShapeDtypeStruct((Mp, H), dt),) * 3,
        grid_spec=pltpu.PrefetchScalarGridSpec(
            num_scalar_prefetch=1,
            grid=(Mp // tm,),
            in_specs=[act_spec, act_spec, lora_spec, w_spec],
            out_specs=[act_spec, act_spec, act_spec],
        ),
        compiler_params=pltpu.CompilerParams(
            dimension_semantics=("parallel",),
            vmem_limit_bytes=_VMEM_LIMIT),
    )(kth.astype(jnp.float32), x1_2d, x2_2d, a2_2d, b2)

    return (_unpad_rows(result, M).reshape(B, S, H),
            _unpad_rows(x1_main, M).reshape(B, S, H),
            _unpad_rows(x2_main, M).reshape(B, S, H))


# --------------------------------------------------------------------------
# Kernel 3: single-pass dual prune (calibration path, after kth computation).
# --------------------------------------------------------------------------
def _prune_pair_kernel(kth_ref, x1_ref, x2_ref, o1_ref, o2_ref):
    kth1 = kth_ref[0]
    kth2 = kth_ref[1]
    x1 = x1_ref[...].astype(jnp.float32)
    x2 = x2_ref[...].astype(jnp.float32)
    o1_ref[...] = jnp.where(jnp.abs(x1) > kth1, x1, 0.0).astype(o1_ref.dtype)
    o2_ref[...] = jnp.where(jnp.abs(x2) > kth2, x2, 0.0).astype(o2_ref.dtype)


def _prune_pair(x1, x2m, kth, tm_cap=512):
    B, S, H = x1.shape
    M = B * S
    dt = x1.dtype
    itemsize = jnp.dtype(dt).itemsize

    # streamed (tm, H) buffers: x1, x2m, o1, o2
    tm = _choose_tm(M, H, 0, 4, itemsize, cap=tm_cap)
    Mp = _round_up(M, tm)

    x1_2d = _pad_rows(x1.reshape(M, H), Mp)
    x2_2d = _pad_rows(x2m.reshape(M, H), Mp)

    act_spec = pl.BlockSpec((tm, H), lambda i, kth_ref: (i, 0))

    o1, o2 = pl.pallas_call(
        _prune_pair_kernel,
        out_shape=(jax.ShapeDtypeStruct((Mp, H), dt),) * 2,
        grid_spec=pltpu.PrefetchScalarGridSpec(
            num_scalar_prefetch=1,
            grid=(Mp // tm,),
            in_specs=[act_spec, act_spec],
            out_specs=[act_spec, act_spec],
        ),
        compiler_params=pltpu.CompilerParams(
            dimension_semantics=("parallel",),
            vmem_limit_bytes=_VMEM_LIMIT),
    )(kth.astype(jnp.float32), x1_2d, x2_2d)

    return (_unpad_rows(o1, M).reshape(B, S, H),
            _unpad_rows(o2, M).reshape(B, S, H))


# --------------------------------------------------------------------------
# Forward (mirrors EfficientMemoryHadamardFuseLoRAFunc.forward)
# --------------------------------------------------------------------------
def efficient_hadamard_fuse_lora_fwd(x1, x2, mask, x1_lora_a, x2_lora_a,
                                     w1_lora_b, w2_lora_b, compress_type,
                                     prune_ratio, iteration,
                                     static_value1, static_value2, batch_size):
    # res1 = (x1_lora_a @ w1_lora_b) * mask has no forward-observable effect
    # (not returned, not saved), so mask / x1_lora_a / w1_lora_b are accepted
    # for interface parity but their HBM traffic is skipped.
    del mask, x1_lora_a, w1_lora_b, batch_size

    if compress_type == 'PRUNE_ROW' and iteration >= 10:
        # Steady state: thresholds known up front -> fully fused single pass.
        kth = jnp.stack([jnp.asarray(static_value1, jnp.float32),
                         jnp.asarray(static_value2, jnp.float32)])
        result, x1_main, x2_main = _hadamard_lora_prune(
            x1, x2, x2_lora_a, w2_lora_b, kth)
        return result, kth[0], kth[1], x1_main, x2_main

    result, x2_main = _hadamard_lora(x1, x2, x2_lora_a, w2_lora_b)
    x1_main = x1
    kth_val_1 = jnp.asarray(0.0, dtype=jnp.float32)
    kth_val_2 = jnp.asarray(0.0, dtype=jnp.float32)

    if compress_type == 'PRUNE_ROW':
        # Calibration (iteration < 10): data-dependent global k-th value.
        # TODO(synk): torch.kthvalue (global order statistic) has no clean
        # single Pallas kernel; computed with jnp.sort on the full tensor.
        k1 = max(1, int(x1_main.size * prune_ratio))
        k2 = max(1, int(x2_main.size * prune_ratio))
        kth_val_1 = jnp.sort(x1_main.reshape(-1))[k1 - 1].astype(jnp.float32)
        kth_val_2 = jnp.sort(x2_main.reshape(-1))[k2 - 1].astype(jnp.float32)
        kth = jnp.stack([kth_val_1, kth_val_2])
        x1_main, x2_main = _prune_pair(x1_main, x2_main, kth)

    # x1_main / x2_main correspond to what torch saves for backward.
    return result, kth_val_1, kth_val_2, x1_main, x2_main


class EfficientMemoryHadamardFuseLoRA:
    """Python-side mirror of the nn.Module state (iteration / running kth)."""

    def __init__(self, compress_type: str = 'PRUNE_ROW',
                 prune_ratio: float = 0.9):
        self.compress_type = compress_type
        self.prune_ratio = prune_ratio
        self.iteration = 0
        self.static_value1 = None
        self.static_value2 = None

    def __call__(self, x1, x2, mask, x1_lora_a, x2_lora_a, w1_lora_b,
                 w2_lora_b, batch_size):
        result, sv1, sv2, _, _ = efficient_hadamard_fuse_lora_fwd(
            x1, x2, mask, x1_lora_a, x2_lora_a, w1_lora_b, w2_lora_b,
            self.compress_type, self.prune_ratio, self.iteration,
            self.static_value1, self.static_value2, batch_size)
        self.static_value1 = sv1 if self.static_value1 is None else (
            (self.iteration * self.static_value1 + sv1) / (self.iteration + 1))
        self.static_value2 = sv2 if self.static_value2 is None else (
            (self.iteration * self.static_value2 + sv2) / (self.iteration + 1))
        self.iteration += 1
        return result


if __name__ == "__main__":
    key = jax.random.PRNGKey(0)
    B, S, H, R = 2, 8, 128, 8
    ks = jax.random.split(key, 7)
    x1 = jax.random.normal(ks[0], (B, S, H), jnp.float32)
    x2 = jax.random.normal(ks[1], (B, S, H), jnp.float32)
    mask = (jax.random.uniform(ks[2], (B, S, H)) > 0.5).astype(jnp.float32)
    x1_lora_a = jax.random.normal(ks[3], (B, S, R), jnp.float32) * 0.1
    x2_lora_a = jax.random.normal(ks[4], (B, S, R), jnp.float32) * 0.1
    w1_lora_b = jax.random.normal(ks[5], (R, H), jnp.float32) * 0.1
    w2_lora_b = jax.random.normal(ks[6], (R, H), jnp.float32) * 0.1

    # ---- reference in plain JAX -----------------------------------------
    ref_result = x1 * x2
    ref_res2 = jnp.einsum('bsr,rh->bsh', x2_lora_a, w2_lora_b)
    ref_x2m_raw = x2 - ref_res2
    k1 = int(x1.size * 0.9)
    k2 = int(ref_x2m_raw.size * 0.9)
    ref_kth1 = jnp.sort(x1.reshape(-1))[k1 - 1]
    ref_kth2 = jnp.sort(ref_x2m_raw.reshape(-1))[k2 - 1]
    ref_x1_main = x1 * (jnp.abs(x1) > ref_kth1)
    ref_x2_main = ref_x2m_raw * (jnp.abs(ref_x2m_raw) > ref_kth2)

    # ---- calibration path (iteration < 10) -------------------------------
    res_dyn = efficient_hadamard_fuse_lora_fwd(
        x1, x2, mask, x1_lora_a, x2_lora_a, w1_lora_b, w2_lora_b,
        'PRUNE_ROW', 0.9, 0, None, None, B)
    result_d, kth1_d, kth2_d, x1m_d, x2m_d = jax.block_until_ready(res_dyn)

    assert result_d.shape == (B, S, H) and result_d.dtype == jnp.float32
    assert jnp.allclose(result_d, ref_result, atol=1e-5)
    assert jnp.allclose(kth1_d, ref_kth1, atol=1e-5)
    assert jnp.allclose(kth2_d, ref_kth2, atol=1e-5)
    assert jnp.allclose(x1m_d, ref_x1_main, atol=1e-5)
    assert jnp.allclose(x2m_d, ref_x2_main, atol=1e-5)

    # ---- fused steady-state path (iteration >= 10) ------------------------
    res_st = efficient_hadamard_fuse_lora_fwd(
        x1, x2, mask, x1_lora_a, x2_lora_a, w1_lora_b, w2_lora_b,
        'PRUNE_ROW', 0.9, 10, kth1_d, kth2_d, B)
    result_s, _, _, x1m_s, x2m_s = jax.block_until_ready(res_st)

    assert jnp.allclose(result_s, ref_result, atol=1e-5)
    assert jnp.allclose(x1m_s, ref_x1_main, atol=1e-5)
    assert jnp.allclose(x2m_s, ref_x2_main, atol=1e-5)

    # ---- module wrapper ---------------------------------------------------
    module = EfficientMemoryHadamardFuseLoRA()
    result_m = module(x1, x2, mask, x1_lora_a, x2_lora_a,
                      w1_lora_b, w2_lora_b, B)
    result_m = jax.block_until_ready(result_m)

    assert jnp.allclose(result_m, ref_result, atol=1e-5)
    assert jnp.allclose(module.static_value1, ref_kth1, atol=1e-5)
    assert jnp.allclose(module.static_value2, ref_kth2, atol=1e-5)
    print("KERNEL_OK")
</pallas_src>

<mosaic_0001>
module attributes {stable_mosaic.version = 11 : i64} {
  func.func @_hadamard_lora_kernel(%arg0: i32, %arg1: memref<16x128xf32, #tpu.memory_space<vmem>>, %arg2: memref<16x128xf32, #tpu.memory_space<vmem>>, %arg3: memref<16x8xf32, #tpu.memory_space<vmem>>, %arg4: memref<8x128xf32, #tpu.memory_space<vmem>>, %arg5: memref<16x128xf32, #tpu.memory_space<vmem>>, %arg6: memref<16x128xf32, #tpu.memory_space<vmem>>) attributes {dimension_semantics = [#tpu.dimension_semantics<parallel>], iteration_bounds = array<i64: 1>, scalar_prefetch = 0 : i64, scratch_operands = 0 : i64, tpu.core_type = #tpu.core_type<tc>, window_params = [{transform_indices = @transform_0, window_bounds = array<i64: 16, 128>}, {transform_indices = @transform_1, window_bounds = array<i64: 16, 128>}, {transform_indices = @transform_2, window_bounds = array<i64: 16, 8>}, {pipeline_mode = #tpu.pipeline_mode<synchronous>, transform_indices = @transform_3, window_bounds = array<i64: 8, 128>}, {transform_indices = @transform_4, window_bounds = array<i64: 16, 128>}, {transform_indices = @transform_5, window_bounds = array<i64: 16, 128>}]} {
    %c0 = arith.constant 0 : index
    %c0_0 = arith.constant 0 : index
    %0 = vector.load %arg1[%c0, %c0_0] : memref<16x128xf32, #tpu.memory_space<vmem>>, vector<16x128xf32>
    %c0_1 = arith.constant 0 : index
    %c0_2 = arith.constant 0 : index
    %1 = vector.load %arg2[%c0_1, %c0_2] : memref<16x128xf32, #tpu.memory_space<vmem>>, vector<16x128xf32>
    %2 = arith.mulf %0, %1 : vector<16x128xf32>
    %c0_3 = arith.constant 0 : index
    %c0_4 = arith.constant 0 : index
    %3 = vector.load %arg5[%c0_3, %c0_4] : memref<16x128xf32, #tpu.memory_space<vmem>>, vector<16x128xf32>
    tpu.vector_store %arg5[%c0_3, %c0_4], %2 {strides = array<i32>} : memref<16x128xf32, #tpu.memory_space<vmem>>, vector<16x128xf32>,
    %c0_5 = arith.constant 0 : index
    %c0_6 = arith.constant 0 : index
    %4 = vector.load %arg3[%c0_5, %c0_6] : memref<16x8xf32, #tpu.memory_space<vmem>>, vector<16x8xf32>
    %c0_7 = arith.constant 0 : index
    %c0_8 = arith.constant 0 : index
    %5 = vector.load %arg4[%c0_7, %c0_8] : memref<8x128xf32, #tpu.memory_space<vmem>>, vector<8x128xf32>
    %cst = arith.constant dense<0.000000e+00> : vector<16x128xf32>
    %6 = tpu.matmul %4, %5, %cst {dimension_numbers = #tpu.dot_dimension_numbers<[1], [0], [0], [1], [0, 0, 1, 1], [], []>} : vector<16x8xf32>, vector<8x128xf32>, vector<16x128xf32> -> vector<16x128xf32>
    %7 = arith.subf %1, %6 : vector<16x128xf32>
    %c0_9 = arith.constant 0 : index
    %c0_10 = arith.constant 0 : index
    %8 = vector.load %arg6[%c0_9, %c0_10] : memref<16x128xf32, #tpu.memory_space<vmem>>, vector<16x128xf32>
    tpu.vector_store %arg6[%c0_9, %c0_10], %7 {strides = array<i32>} : memref<16x128xf32, #tpu.memory_space<vmem>>, vector<16x128xf32>,
    return
  }
  func.func @transform_0(%arg0: i32) -> (i32, i32) {
    %c0_i32 = arith.constant 0 : i32
    %c0_i32_0 = arith.constant 0 : i32
    return %arg0, %c0_i32 : i32, i32
  }
  func.func @transform_1(%arg0: i32) -> (i32, i32) {
    %c0_i32 = arith.constant 0 : i32
    %c0_i32_0 = arith.constant 0 : i32
    return %arg0, %c0_i32 : i32, i32
  }
  func.func @transform_2(%arg0: i32) -> (i32, i32) {
    %c0_i32 = arith.constant 0 : i32
    %c0_i32_0 = arith.constant 0 : i32
    return %arg0, %c0_i32 : i32, i32
  }
  func.func @transform_3(%arg0: i32) -> (i32, i32) {
    %c0_i32 = arith.constant 0 : i32
    %c0_i32_0 = arith.constant 0 : i32
    %c0_i32_1 = arith.constant 0 : i32
    return %c0_i32, %c0_i32_0 : i32, i32
  }
  func.func @transform_4(%arg0: i32) -> (i32, i32) {
    %c0_i32 = arith.constant 0 : i32
    %c0_i32_0 = arith.constant 0 : i32
    return %arg0, %c0_i32 : i32, i32
  }
  func.func @transform_5(%arg0: i32) -> (i32, i32) {
    %c0_i32 = arith.constant 0 : i32
    %c0_i32_0 = arith.constant 0 : i32
    return %arg0, %c0_i32 : i32, i32
  }
}

</mosaic_0001>

<bundles_post_ra>
// kernel: tpu_custom_call.1
= control target key start
LH: loop header
LB: loop body
LE: loop exit
PB: predicated region body
PF: predicated region fallthrough
CT: control target
= control target key end

     0   :  { %11 = vsyncpa [#allocation3], 0  ;;  %s498_s0 = inlined_call_operand.hbm [shape: f32[16,128], index: 0, kind: input, shape index: {}]   ;;  %s499_s1 = inlined_call_operand.hbm [shape: f32[16,128], index: 1, kind: input, shape index: {}]   ;;  %s500_s2 = inlined_call_operand.hbm [shape: f32[16,8], index: 2, kind: input, shape index: {}]   ;;  %s501_s3 = inlined_call_operand.hbm [shape: f32[8,128], index: 3, kind: input, shape index: {}]   ;;  %s502_s4 = inlined_call_operand.hbm [shape: f32[16,128], index: 4, kind: output, shape index: {0}]   ;;  %s503_s5 = inlined_call_operand.hbm [shape: f32[16,128], index: 5, kind: output, shape index: {1}]  }
   0x1   :  { %12 = vsyncpa [#allocation6], 0 }
   0x2   :  { %13 = vsyncpa [#allocation9], 0 }
   0x3   :  { %14 = vsyncpa [#allocation4], 0 }
   0x4   :  { %15 = vsyncpa [#allocation12], 0  ;;  %s366_s18 = smov [#allocation5]   ;;  %s367_s20 = smov [#allocation2]  }
   0x5   :  { %s33_s19 = sshll.u32 %s366_s18, 4  ;;  %s21_s21 = sshll.u32 %s367_s20, 4  ;;  %s34_s19 = int_to_ptr.vmem [resolvable:$true] %s33_s19  ;;  %s404_s21 = int_to_ptr.vmem [resolvable:$true] %s21_s21 }
   0x6   :  { %s224_s24 = scalar_lea.hbm %s499_s1, 256 }
   0x7   :  { %p225_p0 = scmp.ne.s32.totalorder %s499_s1, %s224_s24  ;;  %p228_p1 = scmp.lt.u32.totalorder %s224_s24, %s499_s1 }
   0x9   :  { %p230_p2 = pnand %p228_p1, %p225_p0 }
   0xb   :  { %233 = shalt.err (!%p230_p2)
}
   0xc   :  { %s234_s29 = scalar_lea.vmem %s34_s19, 256  ;;  %p239_p4 = scmp.lt.s32.totalorder %s34_s19, %s34_s19 }
   0xd   :  { %p235_p3 = scmp.ne.s32.totalorder %s34_s19, %s234_s29  ;;  %p240_p5 = scmp.lt.s32.totalorder %s234_s29, %s234_s29 }
   0xf   :  { %p241_p6 = por %p240_p5, %p239_p4 }
  0x11   :  { %p242_p7 = pnand %p241_p6, %p235_p3 }
  0x13   :  { %245 = shalt.err (!%p242_p7)
}
  0x14   :  { %s368_s30 = smov 128   ;;  %s369_s6 = smov 8  }
  0x15   :  { %39 = dma.hbm_to_vmem [thread:$0]  %s499_s1, 256, %s34_s19, [#allocation6], %s368_s30, %s368_s30, %s369_s6  }
  0x16   :  { %s246_s11 = scalar_lea.hbm %s498_s0, 256 }
  0x17   :  { %p247_p8 = scmp.ne.s32.totalorder %s498_s0, %s246_s11  ;;  %p250_p9 = scmp.lt.u32.totalorder %s246_s11, %s498_s0 }
  0x19   :  { %p252_p10 = pnand %p250_p9, %p247_p8 }
  0x1b   :  { %255 = shalt.err (!%p252_p10)
}
  0x1c   :  { %s256_s16 = scalar_lea.vmem %s404_s21, 256  ;;  %p261_p12 = scmp.lt.s32.totalorder %s404_s21, %s404_s21 }
  0x1d   :  { %p257_p11 = scmp.ne.s32.totalorder %s404_s21, %s256_s16  ;;  %p262_p13 = scmp.lt.s32.totalorder %s256_s16, %s256_s16 }
  0x1f   :  { %p263_p0 = por %p262_p13, %p261_p12 }
  0x21   :  { %p264_p1 = pnand %p263_p0, %p257_p11 }
  0x23   :  { %267 = shalt.err (!%p264_p1)
}
  0x24   :  { %27 = dma.hbm_to_vmem [thread:$0]  %s498_s0, 256, %s404_s21, [#allocation3], %s368_s30, %s368_s30, %s369_s6  }
  0x25   :  { %s370_s18 = smov [#allocation7]   ;;  %s371_s20 = smov [#allocation8]  }
  0x26   :  { %s45_s19 = sshll.u32 %s370_s18, 4  ;;  %s58_s22 = sshll.u32 %s371_s20, 4  ;;  %s46_s19 = int_to_ptr.vmem [resolvable:$true] %s45_s19  ;;  %s59_s22 = int_to_ptr.vmem [resolvable:$true] %s58_s22 }
  0x27   :  { %s268_s25 = scalar_lea.hbm %s500_s2, 256 }
  0x28   :  { %p269_p2 = scmp.ne.s32.totalorder %s500_s2, %s268_s25  ;;  %p272_p3 = scmp.lt.u32.totalorder %s268_s25, %s500_s2 }
  0x2a   :  { %p274_p4 = pnand %p272_p3, %p269_p2 }
  0x2c   :  { %277 = shalt.err (!%p274_p4)
}
  0x2d   :  { %s278_s0 = scalar_lea.vmem %s46_s19, 256  ;;  %p283_p6 = scmp.lt.s32.totalorder %s46_s19, %s46_s19 }
  0x2e   :  { %p279_p5 = scmp.ne.s32.totalorder %s46_s19, %s278_s0  ;;  %p284_p7 = scmp.lt.s32.totalorder %s278_s0, %s278_s0 }
  0x30   :  { %p285_p8 = por %p284_p7, %p283_p6 }
  0x32   :  { %p286_p9 = pnand %p285_p8, %p279_p5 }
  0x34   :  { %289 = shalt.err (!%p286_p9)
}
  0x35   :  { %51 = dma.hbm_to_vmem [thread:$0]  %s500_s2, 256, %s46_s19, [#allocation6], %s368_s30, %s368_s30, %s369_s6  }
  0x36   :  { %s290_s10 = scalar_lea.hbm %s501_s3, 128 }
  0x37   :  { %p291_p10 = scmp.ne.s32.totalorder %s501_s3, %s290_s10  ;;  %p294_p11 = scmp.lt.u32.totalorder %s290_s10, %s501_s3 }
  0x39   :  { %p296_p12 = pnand %p294_p11, %p291_p10 }
  0x3b   :  { %299 = shalt.err (!%p296_p12)
}
  0x3c   :  { %s300_s15 = scalar_lea.vmem %s59_s22, 128  ;;  %p305_p0 = scmp.lt.s32.totalorder %s59_s22, %s59_s22 }
  0x3d   :  { %p301_p13 = scmp.ne.s32.totalorder %s59_s22, %s300_s15  ;;  %p306_p1 = scmp.lt.s32.totalorder %s300_s15, %s300_s15 }
  0x3f   :  { %p307_p2 = por %p306_p1, %p305_p0 }
  0x41   :  { %p308_p3 = pnand %p307_p2, %p301_p13 }
  0x43   :  { %311 = shalt.err (!%p308_p3)
}
  0x44   :  { %61 = dma.hbm_to_vmem [thread:$0]  %s501_s3, 128, %s59_s22, [#allocation9]  }
  0x45   :  { %356 = dma.done.wait [#allocation3], 256  }
  0x46   :  { %357 = vsyncadd [#allocation3], 4294967040 }
  0x47   :  { %358 = dma.done.wait [#allocation6], 512  }
  0x48   :  { %359 = vsyncadd [#allocation6], 4294966784 }
  0x49   :  { %360 = dma.done.wait [#allocation9], 128  }
  0x4a   :  { %361 = vsyncadd [#allocation9], 4294967168  ;;  %vm85_vm0 = vcmask 64512   ;;  %v84_v0 = vld [vmem:[#allocation8] sm:$0xff]  ;;  %v82_v1 = vld [vmem:[#allocation7] sm:$0xff]  ;;  %s372_s3 = smov [#allocation10]  }
  0x4b   :  { %v83_v2 = vld [vmem:[#allocation7 + $0x8] sm:$0xff]  ;;  %211 = vmatprep.subr.mxu0 %v84_v0  ;;  %213 = vmatprep.mubr.msk.f32.mxu0 %vm85_vm0, %v82_v1  ;;  %v77_v4 = vld [vmem:[#allocation5 + $0x8] sm:$0xff]  ;;  %v74_v6 = vld [vmem:[#allocation2] sm:$0xff]  ;;  %s176_s1 = sshll.u32 %s372_s3, 4  ;;  %s177_s1 = int_to_ptr.vmem [resolvable:$true] %s176_s1 }
  0x4c   :  { %v75_v3 = vld [vmem:[#allocation2 + $0x8] sm:$0xff]  ;;  %212 = vmatpush3.msra.mxu0 %v84_v0  ;;  %v76_v7 = vld [vmem:[#allocation5] sm:$0xff]  ;;  %s312_s17 = scalar_lea.vmem %s177_s1, 256  ;;  %p317_p5 = scmp.lt.s32.totalorder %s177_s1, %s177_s1 }
  0x4d   :  { %v79_v5 = vmul.f32 %v77_v4, %v75_v3  ;;  %214 = vmatmul.mubr.msk.f32.vlgmr.msra.gmra.mrb[0].mxu0 %vm85_vm0, %v83_v2  ;;  %v78_v8 = vmul.f32 %v76_v7, %v74_v6  ;;  %p313_p4 = scmp.ne.s32.totalorder %s177_s1, %s312_s17  ;;  %p318_p6 = scmp.lt.s32.totalorder %s312_s17, %s312_s17 }
  0x4f   :  { %81 = vst [vmem:[#allocation10 + $0x8] sm:$0xff] %v79_v5  ;;  %80 = vst [vmem:[#allocation10] sm:$0xff] %v78_v8  ;;  %p319_p7 = por %p318_p6, %p317_p5 }
  0x51   :  { %p320_p8 = pnand %p319_p7, %p313_p4 }
  0x53   :  { %323 = shalt.err (!%p320_p8)
}
  0x54   :  { %s324_s20 = scalar_lea.hbm %s502_s4, 256 }
  0x55   :  { %p325_p9 = scmp.ne.s32.totalorder %s502_s4, %s324_s20  ;;  %p328_p10 = scmp.lt.u32.totalorder %s324_s20, %s502_s4 }
  0x57   :  { %p330_p11 = pnand %p328_p10, %p325_p9 }
  0x59   :  { %333 = shalt.err (!%p330_p11)
}
  0x5a   :  { %182 = dma.vmem_to_hbm [thread:$0]  %s177_s1, 256, %s502_s4, [#allocation4], %s368_s30, %s368_s30, %s369_s6  }
  0x5b   :  { %s373_s28 = smov [#allocation11]  }
  0x5c   :  { %s188_s29 = sshll.u32 %s373_s28, 4  ;;  %s189_s29 = int_to_ptr.vmem [resolvable:$true] %s188_s29 }
  0x5d   :  { %s334_s0 = scalar_lea.vmem %s189_s29, 256  ;;  %p339_p13 = scmp.lt.s32.totalorder %s189_s29, %s189_s29 }
  0x5e   :  { %p335_p12 = scmp.ne.s32.totalorder %s189_s29, %s334_s0  ;;  %p340_p0 = scmp.lt.s32.totalorder %s334_s0, %s334_s0 }
  0x60   :  { %p341_p1 = por %p340_p0, %p339_p13 }
  0x62   :  { %p342_p2 = pnand %p341_p1, %p335_p12 }
 0x120   :  { %v215_v9 = vpop.f32.mrb[0].mxu0 }
 0x121   :  { %v168_v10 = vsub.f32 %v77_v4, %v215_v9  ;;  %v158_v11 = vpop.f32.mrb[1].mxu0 }
 0x122   :  { %v167_v12 = vsub.f32 %v76_v7, %v158_v11 }
 0x123   :  { %170 = vst [vmem:[#allocation11 + $0x8] sm:$0xff] %v168_v10 }
 0x124   :  { %169 = vst [vmem:[#allocation11] sm:$0xff] %v167_v12 }
 0x125   :  { %345 = shalt.err (!%p342_p2)
}
 0x126   :  { %s346_s4 = scalar_lea.hbm %s503_s5, 256 }
 0x127   :  { %p347_p3 = scmp.ne.s32.totalorder %s503_s5, %s346_s4  ;;  %p350_p4 = scmp.lt.u32.totalorder %s346_s4, %s503_s5 }
 0x129   :  { %p352_p5 = pnand %p350_p4, %p347_p3 }
 0x12b   :  { %355 = shalt.err (!%p352_p5)
}
 0x12c   :  { %194 = dma.vmem_to_hbm [thread:$0]  %s189_s29, 256, %s503_s5, [#allocation12], %s368_s30, %s368_s30, %s369_s6  }
 0x12d   :  { %362 = dma.done.wait [#allocation4], 256  }
 0x12e   :  { %363 = vsyncadd [#allocation4], 4294967040 }
 0x12f   :  { %364 = dma.done.wait [#allocation12], 256  }
 0x130   :  { %365 = vsyncadd [#allocation12], 4294967040 }
 0x131   :  { %201 = vsyncpa [#allocation3], 1 }
 0x132   :  { %202 = vsyncpa [#allocation6], 1 }
 0x133   :  { %203 = vsyncpa [#allocation9], 1 }
 0x134   :  { %204 = vsyncpa [#allocation4], 1 }
 0x135   :  { %205 = vsyncpa [#allocation12], 1 }

</bundles_post_ra>
